<compile_context>
chip_gen: v7x
topology: tpu7x:2x2x1
jax: 0.10.0
libtpu: 0.0.40
codegen_flags: <defaults>
</compile_context>

<pallas_src>
import functools

import jax
import jax.numpy as jnp
from jax.experimental import pallas as pl
from jax.experimental.pallas import tpu as pltpu


# ---------------------------------------------------------------- kernel body
def _solver_kernel(method, n_steps, c_ref, x_ref, w1t_ref, b1t_ref, w2t_ref,
                   b2t_ref, o_ref):
    # scalar coefficients from SMEM (hoisted out of the step loop)
    h = c_ref[0]
    h_half = c_ref[1]     # h/2
    h_sixth = c_ref[2]    # h/6
    neg_h = c_ref[3]      # -h
    two_h = c_ref[4]      # 2h

    w1t = w1t_ref[...]    # (H, d)
    b1t = b1t_ref[...]    # (H, 1)
    w2t = w2t_ref[...]    # (d, H)
    b2t = b2t_ref[...]    # (d, 1)

    def f(zt):            # zt: (d, TILE_B) -> (d, TILE_B), batch on lanes
        hid = jnp.tanh(jnp.dot(w1t, zt, preferred_element_type=jnp.float32) + b1t)
        return jnp.dot(w2t, hid, preferred_element_type=jnp.float32) + b2t

    def step(xt):
        if method == "explicitEuler":
            return xt + h * f(xt)
        if method == "Heun":
            k1 = f(xt)
            k2 = f(xt + h * k1)
            return xt + h_half * (k1 + k2)
        if method == "RK3":
            k1 = f(xt)
            # NOTE: reference evaluates k2 = f(k1), not f(x + h/2*k1) — kept.
            k2 = f(k1)
            k3 = f(xt + neg_h * (k1 + two_h * k2))
            return xt + h_sixth * (k1 + (4.0 * k2 + k3))
        if method == "RK4":
            k1 = f(xt)
            k2 = f(xt + h_half * k1)
            k3 = f(xt + h_half * k2)
            k4 = f(xt + h * k3)
            # NOTE: reference weights are (2,1,1,2)/6 — kept.
            return xt + h_sixth * (2.0 * k1 + (k2 + (k3 + 2.0 * k4)))
        raise ValueError(f"unknown method {method}")

    x0 = x_ref[...]
    if n_steps == 1:
        out = step(x0)
    else:
        out = jax.lax.fori_loop(0, n_steps, lambda _, xc: step(xc), x0)
    o_ref[...] = out.astype(o_ref.dtype)


# ---------------------------------------------------------------- wrapper
def _round_up(a, b):
    return ((a + b - 1) // b) * b


def explicit_solver(h, x, w1, b1, w2, b2, *, method="explicitEuler",
                    n_steps=1, tile_b=512):
    """n_steps fused integrator steps.  x:(B,d) f32 -> (B,d) f32."""
    B, d = x.shape
    H = w1.shape[1]

    # Lane-dense transposed layout (feature dim on sublanes, batch on lanes).
    xT = x.T                               # (d, B)
    w1t = w1.T                             # (H, d)
    w2t = w2.T                             # (d, H)
    b1t = b1.reshape(H, 1)
    b2t = b2.reshape(d, 1)

    # Batch tile: lane-aligned multiple of 128; pad B if it does not divide.
    TB = tile_b if B > tile_b else _round_up(B, 128)
    B_pad = _round_up(B, TB)
    if B_pad != B:
        xT = jnp.pad(xT, ((0, 0), (0, B_pad - B)))
    grid = (B_pad // TB,)

    hf = jnp.float32(h)
    coeffs = jnp.stack([hf, hf * 0.5, hf / 6.0, -hf, 2.0 * hf]).astype(jnp.float32)

    kernel = functools.partial(_solver_kernel, method, int(n_steps))
    outT = pl.pallas_call(
        kernel,
        out_shape=jax.ShapeDtypeStruct((d, B_pad), jnp.float32),
        grid=grid,
        in_specs=[
            pl.BlockSpec(memory_space=pltpu.MemorySpace.SMEM),  # coefficients
            pl.BlockSpec((d, TB), lambda i: (0, i)),            # x^T batch tile
            pl.BlockSpec((H, d), lambda i: (0, 0)),             # W1^T (resident)
            pl.BlockSpec((H, 1), lambda i: (0, 0)),             # b1^T (resident)
            pl.BlockSpec((d, H), lambda i: (0, 0)),             # W2^T (resident)
            pl.BlockSpec((d, 1), lambda i: (0, 0)),             # b2^T (resident)
        ],
        out_specs=pl.BlockSpec((d, TB), lambda i: (0, i)),
        compiler_params=pltpu.CompilerParams(
            dimension_semantics=("parallel",)),
    )(coeffs, xT, w1t, b1t, w2t, b2t)

    return outT[:, :B].T


# ---------------------------------------------------------------- pure-JAX ref
def _ode_ref(x, w1, b1, w2, b2):
    hid = jnp.tanh(jnp.dot(x, w1, preferred_element_type=jnp.float32) + b1)
    return jnp.dot(hid, w2, preferred_element_type=jnp.float32) + b2


def _reference_step(h, x, w1, b1, w2, b2, method):
    f = lambda z: _ode_ref(z, w1, b1, w2, b2)
    if method == "explicitEuler":
        return x + h * f(x)
    if method == "Heun":
        k1 = f(x)
        k2 = f(x + h * k1)
        return x + h / 2.0 * (k1 + k2)
    if method == "RK3":
        k1 = f(x)
        k2 = f(k1)
        k3 = f(x + (-h) * (k1 + 2.0 * h * k2))
        return x + h / 6.0 * (k1 + (4.0 * k2 + k3))
    if method == "RK4":
        k1 = f(x)
        k2 = f(x + h / 2.0 * k1)
        k3 = f(x + h / 2.0 * k2)
        k4 = f(x + h * k3)
        return x + h / 6.0 * (2.0 * k1 + (k2 + (k3 + 2.0 * k4)))
    raise ValueError(method)


def _reference_rollout(h, x, w1, b1, w2, b2, method, n_steps):
    for _ in range(n_steps):
        x = _reference_step(h, x, w1, b1, w2, b2, method)
    return x


# ---------------------------------------------------------------- main
if __name__ == "__main__":
    B, D, H = 256, 4, 32          # batch, problem dim d, ODE-MLP hidden width
    key = jax.random.PRNGKey(0)
    kx, kw1, kb1, kw2, kb2 = jax.random.split(key, 5)

    x = jax.random.normal(kx, (B, D), dtype=jnp.float32)
    w1 = 0.1 * jax.random.normal(kw1, (D, H), dtype=jnp.float32)
    b1 = 0.1 * jax.random.normal(kb1, (1, H), dtype=jnp.float32)
    w2 = 0.1 * jax.random.normal(kw2, (H, D), dtype=jnp.float32)
    b2 = 0.1 * jax.random.normal(kb2, (1, D), dtype=jnp.float32)
    h = 0.1

    methods = ("explicitEuler", "Heun", "RK3", "RK4")

    # Single step (matches ExplicitSolver.forward semantics), single batch tile.
    for method in methods:
        out = jax.block_until_ready(
            explicit_solver(h, x, w1, b1, w2, b2, method=method))
        ref = _reference_rollout(h, x, w1, b1, w2, b2, method, 1)
        assert out.shape == (B, D) and out.dtype == jnp.float32
        assert jnp.allclose(out, ref, atol=1e-5, rtol=1e-5), method

    # Fused multi-step rollout + multi-block batch grid (tile_b=128 -> grid=(2,)).
    for method in ("explicitEuler", "RK4"):
        out = jax.block_until_ready(
            explicit_solver(h, x, w1, b1, w2, b2, method=method,
                            n_steps=4, tile_b=128))
        ref = _reference_rollout(h, x, w1, b1, w2, b2, method, 4)
        assert out.shape == (B, D)
        assert jnp.allclose(out, ref, atol=1e-4, rtol=1e-4), method

    print("KERNEL_OK")
</pallas_src>

<mosaic_0001>
module attributes {stable_mosaic.version = 11 : i64} {
  func.func @_solver_kernel(%arg0: i32, %arg1: memref<5xf32, #tpu.memory_space<smem>>, %arg2: memref<4x256xf32, #tpu.memory_space<vmem>>, %arg3: memref<32x4xf32, #tpu.memory_space<vmem>>, %arg4: memref<32x1xf32, #tpu.memory_space<vmem>>, %arg5: memref<4x32xf32, #tpu.memory_space<vmem>>, %arg6: memref<4x1xf32, #tpu.memory_space<vmem>>, %arg7: memref<4x256xf32, #tpu.memory_space<vmem>>) attributes {dimension_semantics = [#tpu.dimension_semantics<parallel>], iteration_bounds = array<i64: 1>, scalar_prefetch = 0 : i64, scratch_operands = 0 : i64, tpu.core_type = #tpu.core_type<tc>, window_params = [{transform_indices = @transform_0, window_bounds = array<i64: 5>}, {transform_indices = @transform_1, window_bounds = array<i64: 4, 256>}, {pipeline_mode = #tpu.pipeline_mode<synchronous>, transform_indices = @transform_2, window_bounds = array<i64: 32, 4>}, {pipeline_mode = #tpu.pipeline_mode<synchronous>, transform_indices = @transform_3, window_bounds = array<i64: 32, 1>}, {pipeline_mode = #tpu.pipeline_mode<synchronous>, transform_indices = @transform_4, window_bounds = array<i64: 4, 32>}, {pipeline_mode = #tpu.pipeline_mode<synchronous>, transform_indices = @transform_5, window_bounds = array<i64: 4, 1>}, {transform_indices = @transform_6, window_bounds = array<i64: 4, 256>}]} {
    %c0 = arith.constant 0 : index
    %0 = memref.load %arg1[%c0] : memref<5xf32, #tpu.memory_space<smem>>
    %c0_0 = arith.constant 0 : index
    %c0_1 = arith.constant 0 : index
    %1 = vector.load %arg3[%c0_0, %c0_1] : memref<32x4xf32, #tpu.memory_space<vmem>>, vector<32x4xf32>
    %c0_2 = arith.constant 0 : index
    %c0_3 = arith.constant 0 : index
    %2 = vector.load %arg4[%c0_2, %c0_3] : memref<32x1xf32, #tpu.memory_space<vmem>>, vector<32x1xf32>
    %c0_4 = arith.constant 0 : index
    %c0_5 = arith.constant 0 : index
    %3 = vector.load %arg5[%c0_4, %c0_5] : memref<4x32xf32, #tpu.memory_space<vmem>>, vector<4x32xf32>
    %c0_6 = arith.constant 0 : index
    %c0_7 = arith.constant 0 : index
    %4 = vector.load %arg6[%c0_6, %c0_7] : memref<4x1xf32, #tpu.memory_space<vmem>>, vector<4x1xf32>
    %c0_8 = arith.constant 0 : index
    %c0_9 = arith.constant 0 : index
    %5 = vector.load %arg2[%c0_8, %c0_9] : memref<4x256xf32, #tpu.memory_space<vmem>>, vector<4x256xf32>
    %cst = arith.constant dense<0.000000e+00> : vector<32x256xf32>
    %6 = tpu.matmul %1, %5, %cst {dimension_numbers = #tpu.dot_dimension_numbers<[1], [0], [0], [1], [0, 0, 1, 1], [], []>} : vector<32x4xf32>, vector<4x256xf32>, vector<32x256xf32> -> vector<32x256xf32>
    %7 = vector.broadcast %2 : vector<32x1xf32> to vector<32x256xf32>
    %8 = arith.addf %6, %7 : vector<32x256xf32>
    %9 = math.tanh %8 : vector<32x256xf32>
    %cst_10 = arith.constant dense<0.000000e+00> : vector<4x256xf32>
    %10 = tpu.matmul %3, %9, %cst_10 {dimension_numbers = #tpu.dot_dimension_numbers<[1], [0], [0], [1], [0, 0, 1, 1], [], []>} : vector<4x32xf32>, vector<32x256xf32>, vector<4x256xf32> -> vector<4x256xf32>
    %11 = vector.broadcast %4 : vector<4x1xf32> to vector<4x256xf32>
    %12 = arith.addf %10, %11 : vector<4x256xf32>
    %13 = vector.broadcast %0 : f32 to vector<4x256xf32>
    %14 = arith.mulf %13, %12 : vector<4x256xf32>
    %15 = arith.addf %5, %14 : vector<4x256xf32>
    %c0_11 = arith.constant 0 : index
    %c0_12 = arith.constant 0 : index
    %16 = vector.load %arg7[%c0_11, %c0_12] : memref<4x256xf32, #tpu.memory_space<vmem>>, vector<4x256xf32>
    tpu.vector_store %arg7[%c0_11, %c0_12], %15 {strides = array<i32>} : memref<4x256xf32, #tpu.memory_space<vmem>>, vector<4x256xf32>,
    return
  }
  func.func @transform_0(%arg0: i32) -> i32 {
    %c0_i32 = arith.constant 0 : i32
    %c0_i32_0 = arith.constant 0 : i32
    return %c0_i32 : i32
  }
  func.func @transform_1(%arg0: i32) -> (i32, i32) {
    %c0_i32 = arith.constant 0 : i32
    %c0_i32_0 = arith.constant 0 : i32
    return %c0_i32, %arg0 : i32, i32
  }
  func.func @transform_2(%arg0: i32) -> (i32, i32) {
    %c0_i32 = arith.constant 0 : i32
    %c0_i32_0 = arith.constant 0 : i32
    %c0_i32_1 = arith.constant 0 : i32
    return %c0_i32, %c0_i32_0 : i32, i32
  }
  func.func @transform_3(%arg0: i32) -> (i32, i32) {
    %c0_i32 = arith.constant 0 : i32
    %c0_i32_0 = arith.constant 0 : i32
    %c0_i32_1 = arith.constant 0 : i32
    return %c0_i32, %c0_i32_0 : i32, i32
  }
  func.func @transform_4(%arg0: i32) -> (i32, i32) {
    %c0_i32 = arith.constant 0 : i32
    %c0_i32_0 = arith.constant 0 : i32
    %c0_i32_1 = arith.constant 0 : i32
    return %c0_i32, %c0_i32_0 : i32, i32
  }
  func.func @transform_5(%arg0: i32) -> (i32, i32) {
    %c0_i32 = arith.constant 0 : i32
    %c0_i32_0 = arith.constant 0 : i32
    %c0_i32_1 = arith.constant 0 : i32
    return %c0_i32, %c0_i32_0 : i32, i32
  }
  func.func @transform_6(%arg0: i32) -> (i32, i32) {
    %c0_i32 = arith.constant 0 : i32
    %c0_i32_0 = arith.constant 0 : i32
    return %c0_i32, %arg0 : i32, i32
  }
}

</mosaic_0001>

<bundles_post_ra>
// kernel: tpu_custom_call.1
= control target key start
LH: loop header
LB: loop body
LE: loop exit
PB: predicated region body
PF: predicated region fallthrough
CT: control target
= control target key end

     0   :  { %11 = vsyncpa [#allocation4], 0  ;;  %s463_s0 = inlined_call_operand.vmem [shape: f32[5], index: 0, kind: input, shape index: {}]   ;;  %s464_s1 = inlined_call_operand.vmem [shape: f32[4,256], index: 1, kind: input, shape index: {}]   ;;  %s465_s2 = inlined_call_operand.vmem [shape: f32[32,4], index: 2, kind: input, shape index: {}]   ;;  %s466_s3 = inlined_call_operand.vmem [shape: f32[32,1], index: 3, kind: input, shape index: {}]   ;;  %s467_s4 = inlined_call_operand.vmem [shape: f32[4,32], index: 4, kind: input, shape index: {}]   ;;  %s468_s5 = inlined_call_operand.vmem [shape: f32[4,1], index: 5, kind: input, shape index: {}]   ;;  %s469_s6 = inlined_call_operand.hbm [shape: f32[4,256], index: 6, kind: output, shape index: {}]  }
   0x1   :  { %12 = vsyncpa [#allocation3], 0  ;;  %s19_s23 = sshll.u32 %s463_s0, 4  ;;  %s20_s23 = int_to_ptr.vmem [resolvable:$true] %s19_s23 }
   0x2   :  { %s328_s24 = scalar_lea.vmem %s20_s23, 16  ;;  %p333_p1 = scmp.lt.s32.totalorder %s20_s23, %s20_s23 }
   0x3   :  { %p329_p0 = scmp.ne.s32.totalorder %s20_s23, %s328_s24  ;;  %p334_p2 = scmp.lt.s32.totalorder %s328_s24, %s328_s24 }
   0x5   :  { %p335_p3 = por %p334_p2, %p333_p1 }
   0x7   :  { %p336_p4 = pnand %p335_p3, %p329_p0 }
   0x9   :  { %339 = shalt.err (!%p336_p4)
}
   0xa   :  { %s366_s25 = smov [#allocation2]  }
   0xb   :  { %22 = dma.vmem_to_smem %s20_s23, 16, %s366_s25, [#allocation4]  }
   0xc   :  { %362 = dma.done.wait [#allocation4], 16  }
   0xd   :  { %363 = vsyncadd [#allocation4], 4294967280 }
   0xe   :  { %36 = sfence }
   0xf   :  { %v411_v0 = vld [vmem:[%s464_s1] sm:$0xff]  ;;  %vm84_vm0 = vcmask 1043456   ;;  %v367_v2 = vmov 0.0   ;;  %vm71_vm1 = vcmask 31744   ;;  %v368_v5 = vmov 0   ;;  %v44_v6 = vld [vmem:[%s466_s3 + $0x10] sm:$0xff] }
  0x10   :  { %v70_v1 = vcombine.high %v411_v0, %v411_v0  ;;  %153 = vmatprep.mubr.f32.mxu0 %v367_v2  ;;  %v42_v3 = vld [vmem:[%s466_s3] sm:$0xff]  ;;  %259 = vmatprep.mubr.f32.mxu1 %v367_v2  ;;  %v43_v7 = vld [vmem:[%s466_s3 + $0x8] sm:$0xff]  ;;  %v45_v8 = vld [vmem:[%s466_s3 + $0x18] sm:$0xff]  ;;  %vm191_vm2 = vcmask 261120   ;;  %s37_s19 = sld [smem:[#allocation2]]  ;;  %s369_s20 = smov [#allocation5]  }
  0x11   :  { %v38_v4 = vld [vmem:[%s465_s2] sm:$0xff]  ;;  %309 = vset.pattern.permute.xlu0 %v368_v5  ;;  %310 = vset.pattern.permute.xlu1 %v368_v5  ;;  %v39_v9 = vld [vmem:[%s465_s2 + $0x8] sm:$0xff]  ;;  %v40_v11 = vld [vmem:[%s465_s2 + $0x10] sm:$0xff]  ;;  %s281_s21 = sshll.u32 %s369_s20, 4  ;;  %s282_s21 = int_to_ptr.vmem [resolvable:$true] %s281_s21 }
  0x12   :  { %290 = vmatprep.subr.msk.mxu0 %vm84_vm0, %v70_v1  ;;  %51 = vperm.xlu0 %309, %v42_v3   ;;  %v47_v10 = vld [vmem:[%s468_s5] sm:$0xf]  ;;  %v41_v12 = vld [vmem:[%s465_s2 + $0x18] sm:$0xff]  ;;  %s340_s22 = scalar_lea.vmem %s282_s21, 128  ;;  %p345_p6 = scmp.lt.s32.totalorder %s282_s21, %s282_s21 }
  0x13   :  { %291 = vmatpush1.msk.msra.mxu0 %vm84_vm0, %v411_v0  ;;  %61 = vperm.xlu1 %310, %v44_v6   ;;  %v46_v45 = vld [vmem:[%s467_s4] sm:$0xf]  ;;  %p341_p5 = scmp.ne.s32.totalorder %s282_s21, %s340_s22  ;;  %p346_p7 = scmp.lt.s32.totalorder %s340_s22, %s340_s22 }
  0x14   :  { %292 = vmatmul.mubr.msk.f32.vlgmr.msra.gmra.mrb[0].mxu0 %vm71_vm1, %v38_v4 }
  0x15   :  { %159 = vmatprep.mubr.f32.mxu0 %v367_v2  ;;  %p347_p8 = por %p346_p7, %p345_p6 }
  0x16   :  { %56 = vperm.xlu0 %309, %v43_v7   ;;  %v266_v48 = vstv %s37_s19 }
  0x17   :  { %66 = vperm.xlu1 %310, %v45_v8   ;;  %p348_p9 = pnand %p347_p8, %p341_p5 }
  0x18   :  { %293 = vmatmul.mubr.msk.f32.gmra.mrb[2].mxu0 %vm71_vm1, %v39_v9 }
  0x19   :  { %165 = vmatprep.mubr.f32.mxu0 %v367_v2 }
  0x1a   :  { %188 = vperm.xlu0 %309, %v47_v10  }
  0x1c   :  { %294 = vmatmul.mubr.msk.f32.gmra.mrb[4].mxu0 %vm71_vm1, %v40_v11 }
  0x1d   :  { %171 = vmatprep.mubr.f32.mxu0 %v367_v2 }
  0x20   :  { %295 = vmatmul.mubr.msk.f32.gmra.mrb[6].mxu0 %vm71_vm1, %v41_v12 }
  0x91   :  { %v52_v13 = vpop.permute.xlu0 %51 }
  0x92   :  { %v62_v22 = vpop.permute.xlu1 %61 }
  0x95   :  { %v57_v18 = vpop.permute.xlu0 %56 }
  0x96   :  { %v67_v28 = vpop.permute.xlu1 %66 }
  0x99   :  { %v189_v46 = vpop.permute.xlu0 %188 }
  0xe7   :  { %v155_v14 = vpop.f32.mrb[0].mxu0 }
  0xe8   :  { %v156_v15 = vadd.f32 %v155_v14, %v52_v13  ;;  %v157_v16 = vpop.f32.mrb[1].mxu0 }
  0xe9   :  { %v158_v17 = vadd.f32 %v157_v16, %v52_v13 }
  0xea   :  { %312 = vtanh.f32 %v156_v15 }
  0xeb   :  { %v161_v19 = vpop.f32.mrb[2].mxu0  ;;  %314 = vtanh.f32 %v158_v17 }
  0xec   :  { %v162_v20 = vadd.f32 %v161_v19, %v57_v18  ;;  %v163_v21 = vpop.f32.mrb[3].mxu0 }
  0xed   :  { %v164_v23 = vadd.f32 %v163_v21, %v57_v18 }
  0xee   :  { %316 = vtanh.f32 %v162_v20 }
  0xef   :  { %318 = vtanh.f32 %v164_v23  ;;  %v167_v24 = vpop.f32.mrb[4].mxu0 }
  0xf0   :  { %v168_v25 = vadd.f32 %v167_v24, %v62_v22  ;;  %v169_v26 = vpop.f32.mrb[5].mxu0 }
  0xf1   :  { %v170_v27 = vadd.f32 %v169_v26, %v62_v22 }
  0xf2   :  { %320 = vtanh.f32 %v168_v25 }
  0xf3   :  { %v173_v29 = vpop.f32.mrb[6].mxu0  ;;  %322 = vtanh.f32 %v170_v27 }
  0xf4   :  { %v174_v30 = vadd.f32 %v173_v29, %v67_v28  ;;  %v175_v31 = vpop.f32.mrb[7].mxu0  ;;  %v313_v33 = vpop.eup %312 }
  0xf5   :  { %v176_v32 = vadd.f32 %v175_v31, %v67_v28  ;;  %v315_v34 = vpop.eup %314 }
  0xf6   :  { %324 = vtanh.f32 %v174_v30 }
  0xf7   :  { %326 = vtanh.f32 %v176_v32 }
  0xf8   :  { %v317_v35 = vpop.eup %316 }
  0xf9   :  { %v319_v36 = vpop.eup %318  ;;  %v299_v37 = vpack.c.bf16 %v317_v35, %v313_v33 }
  0xfa   :  { %v297_v38 = vpack.c.bf16 %v319_v36, %v315_v34 }
  0xfc   :  { %298 = vmatprep.subr.bf16.mxu1 %v297_v38  ;;  %v321_v39 = vpop.eup %320 }
  0xfd   :  { %300 = vmatpush1.bf16.msra.mxu1 %v299_v37  ;;  %v323_v40 = vpop.eup %322 }
 0x100   :  { %v325_v41 = vpop.eup %324 }
 0x101   :  { %v327_v42 = vpop.eup %326  ;;  %v303_v43 = vpack.c.bf16 %v325_v41, %v321_v39 }
 0x102   :  { %v301_v44 = vpack.c.bf16 %v327_v42, %v323_v40 }
 0x104   :  { %302 = vmatprep.subr.bf16.mxu1 %v301_v44 }
 0x105   :  { %304 = vmatpush1.bf16.msra.mxu1 %v303_v43 }
 0x108   :  { %296 = vmatmul.mubr.msk.f32.vlgmr.msra.gmra.mrb[0].mxu1 %vm191_vm2, %v46_v45 }
 0x1db   :  { %v261_v47 = vpop.f32.mrb[0].mxu1 }
 0x1dc   :  { %v262_v49 = vadd.f32 %v261_v47, %v189_v46  ;;  %v263_v50 = vpop.f32.mrb[1].mxu1 }
 0x1dd   :  { %v264_v51 = vadd.f32 %v263_v50, %v189_v46 }
 0x1de   :  { %v267_v52 = vmul.f32 %v266_v48, %v262_v49 }
 0x1df   :  { %v268_v53 = vmul.f32 %v266_v48, %v264_v51 }
 0x1e1   :  { %v271_v54 = vcombine.low %v267_v52, %v268_v53 }
 0x1e3   :  { %v273_v55 = vadd.f32 %v271_v54, %v411_v0 }
 0x1e5   :  { %274 = vst [vmem:[#allocation5] sm:$0xff] %v273_v55 }
 0x1e6   :  { %351 = shalt.err (!%p348_p9)
}
 0x1e7   :  { %s352_s24 = scalar_lea.hbm %s469_s6, 128 }
 0x1e8   :  { %p353_p10 = scmp.ne.s32.totalorder %s469_s6, %s352_s24  ;;  %p356_p11 = scmp.lt.u32.totalorder %s352_s24, %s469_s6 }
 0x1ea   :  { %p358_p12 = pnand %p356_p11, %p353_p10 }
 0x1ec   :  { %361 = shalt.err (!%p358_p12)
}
 0x1ed   :  { %284 = dma.vmem_to_hbm [thread:$0]  %s282_s21, 128, %s469_s6, [#allocation3]  }
 0x1ee   :  { %364 = dma.done.wait [#allocation3], 128  }
 0x1ef   :  { %365 = vsyncadd [#allocation3], 4294967168 }
 0x1f0   :  { %288 = vsyncpa [#allocation3], 1 }
 0x1f1   :  { %289 = vsyncpa [#allocation4], 1 }

</bundles_post_ra>
